<compile_context>
chip_gen: v7x
topology: tpu7x:2x2x1
jax: 0.10.0
libtpu: 0.0.40
codegen_flags: <defaults>
</compile_context>

<pallas_src>
import functools

import jax
import jax.numpy as jnp
from jax import lax
from jax.experimental import pallas as pl
from jax.experimental.pallas import tpu as pltpu


# --------------------------------------------------------------------------
# VMEM budgeting (generation-aware).
# --------------------------------------------------------------------------
def _tpu_vmem_capacity_bytes():
    try:
        cap = int(pltpu.get_tpu_info().vmem_capacity_bytes)
        if cap > 0:
            return cap
    except Exception:
        pass
    # Conservative fallback (v7x-sized per-TensorCore VMEM).
    return 64 * 1024 * 1024


def _vmem_budget():
    phys = _tpu_vmem_capacity_bytes()
    # 96 MiB on 128-MiB parts (v5e/v6e), 48 MiB on 64-MiB parts (v7x).
    vmem_limit = min(phys * 3 // 4, 96 * 1024 * 1024)
    return vmem_limit, phys


# --------------------------------------------------------------------------
# Fused single-pass kernel (whole (C, T) slab resident; small/medium slabs).
# --------------------------------------------------------------------------
def _gln_fused_kernel(x_ref, gamma_ref, beta_ref, o_ref, *, eps, inv_count):
    x = x_ref[...].astype(jnp.float32)                     # (1, C, T)
    row_s = jnp.sum(x, axis=2, keepdims=True)              # (1, C, 1)
    row_q = jnp.sum(x * x, axis=2, keepdims=True)          # (1, C, 1)
    s = jnp.sum(row_s, axis=1, keepdims=True)              # (1, 1, 1)
    q = jnp.sum(row_q, axis=1, keepdims=True)              # (1, 1, 1)
    mean = s * inv_count
    var = jnp.maximum(q * inv_count - mean * mean, 0.0)    # clamp: cancellation
    inv_std = lax.rsqrt(var + eps)
    gamma = gamma_ref[...].astype(jnp.float32)[None]       # (1, C, 1)
    beta = beta_ref[...].astype(jnp.float32)[None]         # (1, C, 1)
    scale = gamma * inv_std                                 # (1, C, 1)
    shift = beta - mean * scale                             # (1, C, 1)
    o_ref[...] = (x * scale + shift).astype(o_ref.dtype)


# --------------------------------------------------------------------------
# Two-pass tiled kernels.
# --------------------------------------------------------------------------
def _gln_stats_kernel(x_ref, sum_ref, sq_ref, *, t_total, t_tile, tps, n_t,
                      mask_last, guard_overflow):
    p = pl.program_id(0)            # T-split (megacore) axis
    j = pl.program_id(2)            # tile index within the split (reduction)
    g = p * tps + j                 # global T tile index

    @pl.when(j == 0)
    def _():
        sum_ref[...] = jnp.zeros_like(sum_ref)
        sq_ref[...] = jnp.zeros_like(sq_ref)

    x = x_ref[...].astype(jnp.float32)                     # (1, C, t_tile)

    def _accum(xv):
        row_s = jnp.sum(xv, axis=2, keepdims=True)         # (1, C, 1)
        row_q = jnp.sum(xv * xv, axis=2, keepdims=True)    # (1, C, 1)
        sum_ref[...] += jnp.sum(row_s, axis=1, keepdims=True)
        sq_ref[...] += jnp.sum(row_q, axis=1, keepdims=True)

    if mask_last:
        # Only the globally-last T tile pays the iota/cmp/select mask.
        @pl.when(g < n_t - 1)
        def _():
            _accum(x)

        @pl.when(g == n_t - 1)
        def _():
            valid = t_total - (n_t - 1) * t_tile
            lane = lax.broadcasted_iota(jnp.int32, x.shape, 2)
            _accum(jnp.where(lane < valid, x, 0.0))
    elif guard_overflow:
        # Split didn't evenly divide n_t: skip the redundant clamped tile.
        @pl.when(g < n_t)
        def _():
            _accum(x)
    else:
        _accum(x)


def _gln_apply_kernel(x_ref, sum_ref, sq_ref, gamma_ref, beta_ref, o_ref, *,
                      eps, inv_count):
    # Fold the stats + affine params into per-channel scale/shift inside the
    # kernel (O(C) work per tile) -> no XLA glue / intermediate HBM round-trip.
    s = sum_ref[...]                                        # (1, 1, 1) f32
    q = sq_ref[...]                                         # (1, 1, 1) f32
    mean = s * inv_count
    var = jnp.maximum(q * inv_count - mean * mean, 0.0)
    inv_std = lax.rsqrt(var + eps)
    gamma = gamma_ref[...].astype(jnp.float32)[None]        # (1, C, 1)
    beta = beta_ref[...].astype(jnp.float32)[None]          # (1, C, 1)
    scale = gamma * inv_std                                  # (1, C, 1)
    shift = beta - mean * scale                              # (1, C, 1)
    x = x_ref[...].astype(jnp.float32)                       # (1, C, t_tile)
    o_ref[...] = (x * scale + shift).astype(o_ref.dtype)


def _pick_t_tile(t, c, itemsize, max_tile_bytes):
    if c * t * itemsize <= max_tile_bytes:
        return t                                            # full T, one tile
    lanes = (max_tile_bytes // (c * itemsize)) // 128 * 128
    lanes = max(lanes, 128)
    return min(lanes, pl.cdiv(t, 128) * 128)


# --------------------------------------------------------------------------
# Wrapper.
# --------------------------------------------------------------------------
def global_channel_layer_norm(x, gamma=None, beta=None, eps=1e-5, *,
                              t_tile=None,
                              max_tile_bytes=None,
                              fused_slab_bytes=None):
    """x: (N, C, T); gamma/beta: (C, 1) (None -> elementwise_affine=False)."""
    n, c, t = x.shape
    itemsize = x.dtype.itemsize
    if gamma is None:
        gamma = jnp.ones((c, 1), jnp.float32)
    if beta is None:
        beta = jnp.zeros((c, 1), jnp.float32)
    gamma = jnp.asarray(gamma, jnp.float32).reshape(c, 1)
    beta = jnp.asarray(beta, jnp.float32).reshape(c, 1)
    inv_count = 1.0 / float(c * t)
    eps = float(eps)

    vmem_limit, phys_vmem = _vmem_budget()
    if fused_slab_bytes is None:
        # ~2x double-buffered in + 2x out + f32 temp headroom.
        fused_slab_bytes = vmem_limit // 6
    if max_tile_bytes is None:
        # in x2 + out x2 + f32 temp + pipeline headroom.
        max_tile_bytes = vmem_limit // 8

    # ---- small/medium slab: single fused pass (1x HBM read of x) ----------
    # NOTE: with N == 1 on a 2-TensorCore chip (v7x) this path runs on a
    # single core; it is still the lowest-HBM-traffic option (2x vs 3x).
    if t_tile is None and c * t * 4 <= fused_slab_bytes:
        kernel = functools.partial(_gln_fused_kernel, eps=eps,
                                   inv_count=inv_count)
        return pl.pallas_call(
            kernel,
            out_shape=jax.ShapeDtypeStruct((n, c, t), x.dtype),
            grid_spec=pltpu.PrefetchScalarGridSpec(
                num_scalar_prefetch=0,
                grid=(n,),
                in_specs=[pl.BlockSpec((1, c, t), lambda i: (i, 0, 0)),
                          pl.BlockSpec((c, 1), lambda i: (0, 0)),
                          pl.BlockSpec((c, 1), lambda i: (0, 0))],
                out_specs=pl.BlockSpec((1, c, t), lambda i: (i, 0, 0))),
            compiler_params=pltpu.CompilerParams(
                dimension_semantics=("parallel",),
                vmem_limit_bytes=vmem_limit),
            cost_estimate=pl.CostEstimate(
                flops=int(6 * n * c * t), transcendentals=0,
                bytes_accessed=int(2 * n * c * t * itemsize)),
        )(x, gamma, beta)

    # ---- large slab: two T-tiled passes ------------------------------------
    if t_tile is None:
        t_tile = _pick_t_tile(t, c, itemsize, max_tile_bytes)
    assert t_tile == t or t_tile % 128 == 0, \
        "t_tile must be full T or a multiple of 128"
    n_t = pl.cdiv(t, t_tile)

    # Very wide C: even a 128-lane tile (double-buffered in+out + f32 temp)
    # may not fit the default scoped budget -> bump the limit (capped at
    # physical VMEM).
    min_tile_needed = c * t_tile * itemsize * 4 + c * t_tile * 4 + (2 << 20)
    if min_tile_needed > vmem_limit:
        vmem_limit = min(min_tile_needed, phys_vmem)
        # TODO(synk): add an explicit C grid axis (partial sums per C chunk)
        # instead of just scaling the VMEM limit for extremely wide C.

    # Megacore-friendly stats grid: with N == 1 (common in streaming
    # inference), add a leading 2-way "parallel" split over T tiles so both
    # TensorCores (v7x) get work; partials are combined by a tiny XLA sum.
    split = 2 if (n == 1 and n_t >= 4) else 1
    tps = pl.cdiv(n_t, split)
    if split * tps == n_t:
        x_stats_idx = lambda p, i, j: (i, 0, p * tps + j)
    else:
        # Clamp the redundant trailing step of the uneven split; the kernel
        # skips its accumulation via the g < n_t guard.
        x_stats_idx = lambda p, i, j: (i, 0, jnp.minimum(p * tps + j, n_t - 1))

    stats_kernel = functools.partial(
        _gln_stats_kernel, t_total=t, t_tile=t_tile, tps=tps, n_t=n_t,
        mask_last=(t % t_tile != 0), guard_overflow=(split * tps != n_t))

    psums, psqs = pl.pallas_call(
        stats_kernel,
        out_shape=(jax.ShapeDtypeStruct((split * n, 1, 1), jnp.float32),
                   jax.ShapeDtypeStruct((split * n, 1, 1), jnp.float32)),
        grid_spec=pltpu.PrefetchScalarGridSpec(
            num_scalar_prefetch=0,
            grid=(split, n, tps),
            in_specs=[pl.BlockSpec((1, c, t_tile), x_stats_idx)],
            out_specs=[pl.BlockSpec((1, 1, 1), lambda p, i, j: (p * n + i, 0, 0)),
                       pl.BlockSpec((1, 1, 1), lambda p, i, j: (p * n + i, 0, 0))]),
        compiler_params=pltpu.CompilerParams(
            dimension_semantics=("parallel", "parallel", "arbitrary"),
            vmem_limit_bytes=vmem_limit),
        cost_estimate=pl.CostEstimate(
            flops=int(3 * n * c * t), transcendentals=0,
            bytes_accessed=int(n * c * t * itemsize)),
    )(x)

    # Combine split partials (tiny (split, N) XLA op; identity when split==1).
    sums = jnp.sum(psums.reshape(split, n), axis=0).reshape(n, 1, 1)
    sqs = jnp.sum(psqs.reshape(split, n), axis=0).reshape(n, 1, 1)

    # Pass 2: out = x * scale + shift, tile by tile; stats -> scale/shift is
    # folded inside the kernel (no XLA glue / (N,C) intermediates).
    apply_kernel = functools.partial(_gln_apply_kernel, eps=eps,
                                     inv_count=inv_count)
    return pl.pallas_call(
        apply_kernel,
        out_shape=jax.ShapeDtypeStruct((n, c, t), x.dtype),
        grid_spec=pltpu.PrefetchScalarGridSpec(
            num_scalar_prefetch=0,
            grid=(n, n_t),
            in_specs=[pl.BlockSpec((1, c, t_tile), lambda i, j: (i, 0, j)),
                      pl.BlockSpec((1, 1, 1), lambda i, j: (i, 0, 0)),
                      pl.BlockSpec((1, 1, 1), lambda i, j: (i, 0, 0)),
                      pl.BlockSpec((c, 1), lambda i, j: (0, 0)),
                      pl.BlockSpec((c, 1), lambda i, j: (0, 0))],
            out_specs=pl.BlockSpec((1, c, t_tile), lambda i, j: (i, 0, j))),
        compiler_params=pltpu.CompilerParams(
            dimension_semantics=("parallel", "parallel"),
            vmem_limit_bytes=vmem_limit),
        cost_estimate=pl.CostEstimate(
            flops=int(2 * n * c * t), transcendentals=0,
            bytes_accessed=int(2 * n * c * t * itemsize)),
    )(x, sums, sqs, gamma, beta)


# --------------------------------------------------------------------------
# Pure-JAX reference (matches the PyTorch module).
# --------------------------------------------------------------------------
def global_channel_layer_norm_ref(x, gamma, beta, eps=1e-5):
    xf = x.astype(jnp.float32)
    mean = jnp.mean(xf, axis=(1, 2), keepdims=True)
    var = jnp.mean((xf - mean) ** 2, axis=(1, 2), keepdims=True)
    out = gamma[None] * (xf - mean) / jnp.sqrt(var + eps) + beta[None]
    return out.astype(x.dtype)


if __name__ == "__main__":
    key = jax.random.PRNGKey(0)
    k1, k2, k3, k4, k5 = jax.random.split(key, 5)

    # Test 1: small shape -> fused single-pass path (module defaults:
    # gamma = ones(C, 1), beta = zeros(C, 1)).
    N, C, T = 2, 4, 16
    x = jax.random.normal(k1, (N, C, T), dtype=jnp.float32)
    gamma = jnp.ones((C, 1), jnp.float32)
    beta = jnp.zeros((C, 1), jnp.float32)
    out = jax.block_until_ready(global_channel_layer_norm(x, gamma, beta, eps=1e-5))
    ref = global_channel_layer_norm_ref(x, gamma, beta, eps=1e-5)
    assert out.shape == (N, C, T)
    assert jnp.allclose(out, ref, atol=1e-4, rtol=1e-4), "mismatch (fused path)"

    # Test 2: force the two-pass T-tiled path (4 tiles of 128 lanes) with
    # non-trivial gamma/beta, N >= 2 (no megacore T split).
    N2, C2, T2 = 2, 8, 512
    x2 = jax.random.normal(k2, (N2, C2, T2), dtype=jnp.float32)
    gamma2 = 1.0 + 0.1 * jax.random.normal(k3, (C2, 1), dtype=jnp.float32)
    beta2 = 0.1 * jnp.arange(C2, dtype=jnp.float32).reshape(C2, 1)
    out2 = jax.block_until_ready(global_channel_layer_norm(
        x2, gamma2, beta2, eps=1e-5, t_tile=128, fused_slab_bytes=0))
    ref2 = global_channel_layer_norm_ref(x2, gamma2, beta2, eps=1e-5)
    assert jnp.allclose(out2, ref2, atol=1e-4, rtol=1e-4), "mismatch (tiled path)"

    # Test 3: C not a multiple of 8, T not a multiple of 128 -> masked edge
    # tile in the stats pass, partial writeback in the apply pass.
    N3, C3, T3 = 2, 6, 200
    x3 = jax.random.normal(k3, (N3, C3, T3), dtype=jnp.float32)
    gamma3 = jnp.ones((C3, 1), jnp.float32)
    beta3 = jnp.zeros((C3, 1), jnp.float32)
    out3 = jax.block_until_ready(global_channel_layer_norm(
        x3, gamma3, beta3, eps=1e-5, t_tile=128, fused_slab_bytes=0))
    ref3 = global_channel_layer_norm_ref(x3, gamma3, beta3, eps=1e-5)
    assert jnp.allclose(out3, ref3, atol=1e-4, rtol=1e-4), "mismatch (edge-tile path)"

    # Test 4: N == 1 -> two-pass path with the 2-way parallel T split in the
    # stats grid (n_t = 5 is odd, so it also exercises the clamp + overflow
    # guard), non-trivial gamma/beta.
    N4, C4, T4 = 1, 8, 640
    x4 = jax.random.normal(k4, (N4, C4, T4), dtype=jnp.float32)
    gamma4 = 1.0 + 0.1 * jax.random.normal(k5, (C4, 1), dtype=jnp.float32)
    beta4 = 0.05 * jnp.arange(C4, dtype=jnp.float32).reshape(C4, 1)
    out4 = jax.block_until_ready(global_channel_layer_norm(
        x4, gamma4, beta4, eps=1e-5, t_tile=128, fused_slab_bytes=0))
    ref4 = global_channel_layer_norm_ref(x4, gamma4, beta4, eps=1e-5)
    assert jnp.allclose(out4, ref4, atol=1e-4, rtol=1e-4), "mismatch (split stats path)"

    # Test 5: elementwise_affine=False (gamma/beta omitted).
    out5 = jax.block_until_ready(global_channel_layer_norm(x, None, None, eps=1e-5))
    ref5 = global_channel_layer_norm_ref(x, jnp.ones((C, 1), jnp.float32),
                                         jnp.zeros((C, 1), jnp.float32), eps=1e-5)
    assert jnp.allclose(out5, ref5, atol=1e-4, rtol=1e-4), "mismatch (no-affine path)"

    print("KERNEL_OK")
</pallas_src>

<mosaic_0001>
module attributes {stable_mosaic.version = 11 : i64} {
  func.func @_gln_fused_kernel(%arg0: i32, %arg1: memref<1x4x16xf32, #tpu.memory_space<vmem>>, %arg2: memref<4x1xf32, #tpu.memory_space<vmem>>, %arg3: memref<4x1xf32, #tpu.memory_space<vmem>>, %arg4: memref<1x4x16xf32, #tpu.memory_space<vmem>>) attributes {dimension_semantics = [#tpu.dimension_semantics<parallel>], iteration_bounds = array<i64: 2>, scalar_prefetch = 0 : i64, scratch_operands = 0 : i64, tpu.core_type = #tpu.core_type<tc>, window_params = [{transform_indices = @transform_0, window_bounds = array<i64: 1, 4, 16>}, {pipeline_mode = #tpu.pipeline_mode<synchronous>, transform_indices = @transform_1, window_bounds = array<i64: 4, 1>}, {pipeline_mode = #tpu.pipeline_mode<synchronous>, transform_indices = @transform_2, window_bounds = array<i64: 4, 1>}, {transform_indices = @transform_3, window_bounds = array<i64: 1, 4, 16>}]} {
    %c0 = arith.constant 0 : index
    %c0_0 = arith.constant 0 : index
    %c0_1 = arith.constant 0 : index
    %0 = vector.load %arg1[%c0, %c0_0, %c0_1] : memref<1x4x16xf32, #tpu.memory_space<vmem>>, vector<1x4x16xf32>
    %cst = arith.constant dense<0.000000e+00> : vector<1x4xf32>
    %1 = vector.multi_reduction <add>, %0, %cst [2] : vector<1x4x16xf32> to vector<1x4xf32>
    %2 = vector.shape_cast %1 : vector<1x4xf32> to vector<1x4x1xf32>
    %3 = arith.mulf %0, %0 : vector<1x4x16xf32>
    %cst_2 = arith.constant dense<0.000000e+00> : vector<1x4xf32>
    %4 = vector.multi_reduction <add>, %3, %cst_2 [2] : vector<1x4x16xf32> to vector<1x4xf32>
    %5 = vector.shape_cast %4 : vector<1x4xf32> to vector<1x4x1xf32>
    %cst_3 = arith.constant dense<0.000000e+00> : vector<1x1xf32>
    %6 = vector.multi_reduction <add>, %2, %cst_3 [1] : vector<1x4x1xf32> to vector<1x1xf32>
    %7 = vector.shape_cast %6 : vector<1x1xf32> to vector<1x1x1xf32>
    %cst_4 = arith.constant dense<0.000000e+00> : vector<1x1xf32>
    %8 = vector.multi_reduction <add>, %5, %cst_4 [1] : vector<1x4x1xf32> to vector<1x1xf32>
    %9 = vector.shape_cast %8 : vector<1x1xf32> to vector<1x1x1xf32>
    %cst_5 = arith.constant 1.562500e-02 : f32
    %10 = vector.broadcast %cst_5 : f32 to vector<1x1x1xf32>
    %11 = arith.mulf %7, %10 : vector<1x1x1xf32>
    %cst_6 = arith.constant 1.562500e-02 : f32
    %12 = vector.broadcast %cst_6 : f32 to vector<1x1x1xf32>
    %13 = arith.mulf %9, %12 : vector<1x1x1xf32>
    %14 = arith.mulf %11, %11 : vector<1x1x1xf32>
    %15 = arith.subf %13, %14 : vector<1x1x1xf32>
    %cst_7 = arith.constant 0.000000e+00 : f32
    %16 = vector.broadcast %cst_7 : f32 to vector<1x1x1xf32>
    %17 = arith.maximumf %15, %16 : vector<1x1x1xf32>
    %cst_8 = arith.constant 9.99999974E-6 : f32
    %18 = vector.broadcast %cst_8 : f32 to vector<1x1x1xf32>
    %19 = arith.addf %17, %18 : vector<1x1x1xf32>
    %20 = math.rsqrt %19 : vector<1x1x1xf32>
    %c0_9 = arith.constant 0 : index
    %c0_10 = arith.constant 0 : index
    %21 = vector.load %arg2[%c0_9, %c0_10] : memref<4x1xf32, #tpu.memory_space<vmem>>, vector<4x1xf32>
    %22 = vector.shape_cast %21 : vector<4x1xf32> to vector<1x4x1xf32>
    %c0_11 = arith.constant 0 : index
    %c0_12 = arith.constant 0 : index
    %23 = vector.load %arg3[%c0_11, %c0_12] : memref<4x1xf32, #tpu.memory_space<vmem>>, vector<4x1xf32>
    %24 = vector.shape_cast %23 : vector<4x1xf32> to vector<1x4x1xf32>
    %25 = vector.broadcast %20 : vector<1x1x1xf32> to vector<1x4x1xf32>
    %26 = arith.mulf %22, %25 : vector<1x4x1xf32>
    %27 = vector.broadcast %11 : vector<1x1x1xf32> to vector<1x4x1xf32>
    %28 = arith.mulf %27, %26 : vector<1x4x1xf32>
    %29 = arith.subf %24, %28 : vector<1x4x1xf32>
    %30 = vector.broadcast %26 : vector<1x4x1xf32> to vector<1x4x16xf32>
    %31 = arith.mulf %0, %30 : vector<1x4x16xf32>
    %32 = vector.broadcast %29 : vector<1x4x1xf32> to vector<1x4x16xf32>
    %33 = arith.addf %31, %32 : vector<1x4x16xf32>
    %c0_13 = arith.constant 0 : index
    %c0_14 = arith.constant 0 : index
    %c0_15 = arith.constant 0 : index
    %34 = vector.load %arg4[%c0_13, %c0_14, %c0_15] : memref<1x4x16xf32, #tpu.memory_space<vmem>>, vector<1x4x16xf32>
    tpu.vector_store %arg4[%c0_13, %c0_14, %c0_15], %33 {strides = array<i32>} : memref<1x4x16xf32, #tpu.memory_space<vmem>>, vector<1x4x16xf32>,
    return
  }
  func.func @transform_0(%arg0: i32) -> (i32, i32, i32) {
    %c0_i32 = arith.constant 0 : i32
    %c0_i32_0 = arith.constant 0 : i32
    %c0_i32_1 = arith.constant 0 : i32
    return %arg0, %c0_i32, %c0_i32_0 : i32, i32, i32
  }
  func.func @transform_1(%arg0: i32) -> (i32, i32) {
    %c0_i32 = arith.constant 0 : i32
    %c0_i32_0 = arith.constant 0 : i32
    %c0_i32_1 = arith.constant 0 : i32
    return %c0_i32, %c0_i32_0 : i32, i32
  }
  func.func @transform_2(%arg0: i32) -> (i32, i32) {
    %c0_i32 = arith.constant 0 : i32
    %c0_i32_0 = arith.constant 0 : i32
    %c0_i32_1 = arith.constant 0 : i32
    return %c0_i32, %c0_i32_0 : i32, i32
  }
  func.func @transform_3(%arg0: i32) -> (i32, i32, i32) {
    %c0_i32 = arith.constant 0 : i32
    %c0_i32_0 = arith.constant 0 : i32
    %c0_i32_1 = arith.constant 0 : i32
    return %arg0, %c0_i32, %c0_i32_0 : i32, i32, i32
  }
}

</mosaic_0001>

<bundles_post_ra>
// kernel: tpu_custom_call.1
= control target key start
LH: loop header
LB: loop body
LE: loop exit
PB: predicated region body
PF: predicated region fallthrough
CT: control target
= control target key end

     0   :  { %8 = vsyncpa [#allocation3], 0  ;;  %s537_s0 = inlined_call_operand.vmem [shape: f32[2,4,16], index: 0, kind: input, shape index: {}]   ;;  %s538_s1 = inlined_call_operand.vmem [shape: f32[4,1], index: 1, kind: input, shape index: {}]   ;;  %s539_s2 = inlined_call_operand.vmem [shape: f32[4,1], index: 2, kind: input, shape index: {}]   ;;  %s540_s3 = inlined_call_operand.hbm [shape: f32[2,4,16], index: 3, kind: output, shape index: {}]  }
   0x1   :  { %10 = vsyncpa [#allocation3 + $0x1], 0  ;;  %s428_s12 = smov 0   ;;  %s430_s13 = smov 0  }
   0x2   :  { %s432_s14 = smov 0   ;;  %s434_s15 = smov 0  }
   0x3 LB: > { %s449_s16 = sadd.s32 4294967295, %s404_s15   ;;  %s288_s17 = sadd.s32 4294967294, %s404_s15   ;;  %s404_s15 = sphi %s434_s15, %s546_s15   ;;  %s400_s14 = sphi %s432_s14, %s545_s14   ;;  %s396_s13 = sphi %s430_s13, %s544_s13   ;;  %s392_s12 = sphi %s428_s12, %s543_s12  }
   0x4   : > { %s453_s18 = sadd.s32 1, %s404_s15   ;;  %s91_s19 = sadd.s32 1, %s400_s14 }
   0x5   : > { %s88_s20 = ssub.s32 %s404_s15, %s453_s18  ;;  %p101_p0 = scmp.ne.s32.totalorder %s400_s14, %s396_s13 }
   0x6   : > { %p89_p1 = scmp.eq.s32.totalorder %s88_s20, 0  ;;  %p102_p2 = scmp.eq.s32.totalorder %s449_s16, 1 }
   0x7   : > { %p107_p3 = scmp.ne.s32.totalorder %s396_s13, %s392_s12  ;;  %p108_p4 = scmp.eq.s32.totalorder %s288_s17, 1 }
   0x8   : > { %s464_s21 = scalar_select %p89_p1, %s400_s14, %s91_s19  }
   0x9   : > { %p466_p5 = por %p102_p2, %p101_p0  ;;  %p470_p6 = por %p108_p4, %p107_p3 }
   0xa   : > { %p291_p7 = scmp.ge.s32.totalorder %s404_s15, 1  ;;  %p139_p8 = scmp.lt.s32.totalorder %s404_s15, 3 }
   0xc   : > { %p140_p9 = pnand %p291_p7, %p139_p8 }
   0xd   : > { %p162_p10 = scmp.lt.s32.totalorder (!%p140_p9), %s449_s16, 1  ;;  %vm167_vm0 = vcmask (!%p140_p9), 125952   ;;  %v406_v4 = vmov (!%p140_p9), 0   ;;  %vm175_vm1 = vcmask (!%p140_p9), 1043456   ;;  %v197_v27 = vld [vmem:[%s538_s1] sm:$0xf] (!%p140_p9) }
   0xe   : > { %143 = sbr.rel (%p140_p9) target bundleno = 355 (0x163), region = 32  ;;  %338 = vset.pattern.permute.xlu1 (!%p140_p9), %v406_v4  ;;  %339 = vset.pattern.permute.xlu0 (!%p140_p9), %v406_v4  ;;  %v198_v30 = vld [vmem:[%s539_s2] sm:$0xf] (!%p140_p9)  ;;  %s159_s6 = sand.u32 (!%p140_p9), 1, %s396_s13  }
   0xf   : > { %s292_s7 = sshll.u32 (!%p140_p9), %s159_s6, 2  ;;  %s295_s8 = sshll.u32 (!%p140_p9), %s449_s16, 6 }
  0x10   : > { %s161_s9 = scalar_lea.vmem (!%p140_p9), [#allocation2], %s292_s7  ;;  %s494_s19 = scalar_lea.hbm (!%p140_p9), %s540_s3, %s295_s8 }
  0x11   : > { %s229_s10 = sshll.u32 (!%p140_p9), %s161_s9, 4  ;;  %s216_s20 = scalar_lea.sflag (!%p140_p9), [#allocation3], %s159_s6  ;;  %s496_s10 = int_to_ptr.vmem [resolvable:$true] %s229_s10 }
  0x15   : > { %s163_s24 = scalar_select %p162_p10, %s449_s16, 1 }
  0x16   : > { %s407_s16 = smov [#allocation2]  }
  0x17   : > { %s293_s25 = sshll.u32 %s163_s24, 2  ;;  %s342_s24 = scalar_lea.vmem %s496_s10, 64 }
  0x18   : > { %s165_s28 = scalar_lea.vmem %s537_s0, %s293_s25  ;;  %p343_p11 = scmp.ne.s32.totalorder %s496_s10, %s342_s24 }
  0x19   : > { %v166_v0 = vld [vmem:[%s165_s28] sm:$0xf]  ;;  %s346_s25 = sshll.u32 %s407_s16, 4  ;;  %s347_s25 = int_to_ptr.vmem [resolvable:$false] %s346_s25 }
  0x1a   : > { %v168_v1 = vsel %vm167_vm0, %v166_v0, 0.0  ;;  %v171_v2 = vmul.f32 %v166_v0, %v166_v0  ;;  %p344_p12 = pnand %p343_p11, %p466_p5  ;;  %s348_s26 = scalar_lea.vmem %s347_s25, 128 }
  0x1b   : > { %169 = vadd.xlane.f32.xlu0 %v168_v1  ;;  %p349_p0 = scmp.lt.s32.totalorder %s496_s10, %s347_s25  ;;  %p350_p1 = scmp.lt.s32.totalorder %s348_s26, %s342_s24 }
  0x1c   : > { %v172_v3 = vsel %vm167_vm0, %v171_v2, 0.0  ;;  %p345_p13 = pneg %p344_p12 }
  0x1d   : > { %p351_p2 = por %p350_p1, %p349_p0 }
  0x1f   : > { %173 = vadd.xlane.f32.xlu0 %v172_v3  ;;  %p352_p3 = pnand %p351_p2, %p345_p13 }
  0xa8   : > { %v170_v5 = vpop.xlane.xlu0 %169 }
  0xa9   : > { %v176_v6 = vsel %vm175_vm1, %v170_v5, 0.0 }
  0xaa   : > { %v177_v7 = vrot.slane %v176_v6, 4 }
  0xac   : > { %v178_v8 = vadd.f32 %v177_v7, %v176_v6  ;;  %v174_v9 = vpop.xlane.xlu0 %173 }
  0xad   : > { %v183_v10 = vsel %vm175_vm1, %v174_v9, 0.0 }
  0xae   : > { %v179_v11 = vrot.slane %v178_v8, 2  ;;  %v184_v12 = vrot.slane %v183_v10, 4 }
  0xb0   : > { %v180_v13 = vadd.f32 %v179_v11, %v178_v8  ;;  %v185_v14 = vadd.f32 %v184_v12, %v183_v10 }
  0xb2   : > { %v181_v15 = vrot.slane %v180_v13, 1  ;;  %v186_v16 = vrot.slane %v185_v14, 2 }
  0xb4   : > { %v182_v17 = vadd.f32 %v181_v15, %v180_v13  ;;  %v187_v18 = vadd.f32 %v186_v16, %v185_v14 }
  0xb6   : > { %v188_v19 = vrot.slane %v187_v18, 1  ;;  %v190_v20 = vmul.f32 0.015625, %v182_v17 }
  0xb8   : > { %v189_v21 = vadd.f32 %v188_v19, %v187_v18  ;;  %v192_v23 = vmul.f32 %v190_v20, %v190_v20 }
  0xba   : > { %v191_v22 = vmul.f32 0.015625, %v189_v21 }
  0xbc   : > { %v193_v24 = vsub.f32 %v191_v22, %v192_v23 }
  0xbe   : > { %v194_v25 = vmax.f32 %v193_v24, 0.0 }
  0xc0   : > { %v195_v26 = vadd.f32 1e-05, %v194_v25 }
  0xc2   : > { %340 = vrsqrt.f32 %v195_v26 }
  0xcc   : > { %v341_v28 = vpop.eup %340 }
  0xcd   : > { %v199_v29 = vmul.f32 %v341_v28, %v197_v27 }
  0xcf   : > { %204 = vperm.xlu1 %338, %v199_v29   ;;  %v200_v31 = vmul.f32 %v199_v29, %v190_v20 }
  0xd1   : > { %v201_v32 = vsub.f32 %v198_v30, %v200_v31 }
  0xd3   : > { %210 = vperm.xlu1 %338, %v201_v32  }
 0x14e   : > { %v205_v33 = vpop.permute.xlu1 %204 }
 0x14f   : > { %v207_v34 = vmul.f32 %v205_v33, %v166_v0 }
 0x152   : > { %v211_v35 = vpop.permute.xlu1 %210 }
 0x153   : > { %v213_v36 = vadd.f32 %v211_v35, %v207_v34 }
 0x155   : > { %214 = vst.msk [vmem:[%s161_s9] sm:$0xf] %vm167_vm0, %v213_v36 }
 0x156   : > { %355 = shalt.err (!%p352_p3)
}
 0x157   : > { %s356_s27 = scalar_lea.hbm %s494_s19, 64  ;;  %s360_s30 = scalar_lea.hbm %s540_s3, 128 }
 0x158   : > { %p357_p4 = scmp.ne.s32.totalorder %s494_s19, %s356_s27  ;;  %p361_p9 = scmp.lt.u32.totalorder %s494_s19, %s540_s3 }
 0x159   : > { %p362_p10 = scmp.lt.u32.totalorder %s360_s30, %s356_s27  ;;  %p364_p12 = scmp.lt.u32.totalorder %s356_s27, %s494_s19 }
 0x15a   : > { %p358_p7 = pnand %p357_p4, %p466_p5 }
 0x15b   : > { %p363_p11 = por %p362_p10, %p361_p9 }
 0x15c   : > { %p359_p8 = pneg %p358_p7 }
 0x15d   : > { %p365_p13 = por %p364_p12, %p363_p11 }
 0x15f   : > { %p366_p0 = pnand %p365_p13, %p359_p8 }
 0x161   : > { %369 = shalt.err (!%p366_p0)
}
 0x162   : > { %298 = dma.vmem_to_hbm [thread:$0]  (%p466_p5), %s496_s10, 64, %s494_s19, %s216_s20  }
 0x163 PF: > { %p304_p1 = scmp.ge.s32.totalorder %s404_s15, 2  ;;  %s241_s6 = sand.u32 1, %s392_s12  }
 0x164   : > { %s242_s7 = scalar_lea.sflag [#allocation3], %s241_s6 }
 0x165   : > { %p301_p2 = pnand %p304_p1, %p470_p6 }
 0x167   : > { %387 = dma.done.wait (!%p301_p2), %s242_s7, 64  }
 0x168   : > { %389 = vsyncadd (!%p301_p2), %s242_s7, 4294967232  ;;  %p13_p3 = scmp.ge.s32.totalorder %s453_s18, 4   ;;  %s543_s12 = smov %s396_s13 }
 0x169   : > { %s544_s13 = smov %s400_s14  ;;  %s545_s14 = smov %s464_s21 }
 0x16a   : > { %s546_s15 = smov %s453_s18  ;;  %15 = sbr.rel (!%p13_p3) target bundleno = 3 (0x3), region = 67 }
 0x171   :  { %247 = vsyncpa [#allocation3], 1 }
 0x172   :  { %249 = vsyncpa [#allocation3 + $0x1], 1 }

</bundles_post_ra>
